<compile_context>
chip_gen: v7x
topology: tpu7x:2x2x1
jax: 0.10.0
libtpu: 0.0.40
codegen_flags: <defaults>
</compile_context>

<pallas_src>
import functools

import jax
import jax.numpy as jnp
from jax import lax
from jax.experimental import pallas as pl
from jax.experimental.pallas import tpu as pltpu

_LANE = 128
_SUBLANE = 8


def _device_kind():
    try:
        return jax.devices()[0].device_kind.lower()
    except Exception:
        return ""


def _num_tensorcores(kind):
    # v7x has 2 TensorCores per chip; v5e / v6e have 1.
    # TODO(synk): switch this axis to pltpu.CORE_PARALLEL if a v7x profile
    # shows "parallel" not actually sharding the two halves across both TCs.
    return 2 if "v7" in kind else 1


def _packed_sublane(dtype):
    # f32 -> 8, bf16/f16 -> 16, int8/bool -> 32 (packed-sublane layout).
    return max(_SUBLANE, 32 // max(1, jnp.dtype(dtype).itemsize))


def _max_tile_rows(kind, bytes_per_row, sub):
    # In-flight VMEM ~= 2 (double buffer) * tile_rows * bytes_per_row.
    if ("v5e" in kind) or ("v5 lite" in kind) or ("v5lite" in kind):
        budget = 8 << 20     # stay inside v5e's 16 MiB default scoped VMEM
    else:
        budget = 16 << 20    # v6e / v7x: 32 MiB default scoped VMEM
    cap = min(8192, budget // (2 * bytes_per_row))
    return max(sub, (cap // sub) * sub)


def _pick_chunk(tile_rows):
    # Largest strip size that divides the tile; tile_rows is always a
    # multiple of the packed-sublane count, so a candidate always matches.
    for c in (1024, 512, 256, 128, 64, 32, 16, 8):
        if tile_rows % c == 0:
            return c
    return tile_rows


def _dice_partial_kernel(pred_ref, targ_ref, out_ref, *,
                         tile_rows, chunk_rows, blocks_per_half, n_rows):
    """Accumulates per-half partial sums of (pred*target) and (pred+target).

    out_ref block: (1, 2, 8, 128) f32, resident in VMEM across the reduction
    axis; [:, 0] holds the intersection partial, [:, 1] the union partial.
    """
    h = pl.program_id(0)
    b = pl.program_id(1)

    @pl.when(b == 0)
    def _():
        out_ref[...] = jnp.zeros_like(out_ref)

    # Unclamped global block index; blocks past the end of the array are
    # clamped to the last valid block in the index_map (DMA stays in bounds)
    # and fully masked out here.
    gi = h * blocks_per_half + b
    block_start = gi * tile_rows
    n_chunks = tile_rows // chunk_rows   # static

    def _strip(c, carry, *, masked):
        acc_i, acc_u = carry
        r0 = pl.multiple_of(c * chunk_rows, chunk_rows)
        p = pred_ref[pl.ds(r0, chunk_rows), :].astype(jnp.float32)
        t = targ_ref[pl.ds(r0, chunk_rows), :].astype(jnp.float32)
        if masked:
            row_ids = lax.broadcasted_iota(jnp.int32, (chunk_rows, _LANE), 0)
            valid = (block_start + r0 + row_ids) < n_rows
            p = jnp.where(valid, p, 0.0)
            t = jnp.where(valid, t, 0.0)
        acc_i = acc_i + jnp.sum(
            (p * t).reshape(chunk_rows // _SUBLANE, _SUBLANE, _LANE), axis=0)
        acc_u = acc_u + jnp.sum(
            (p + t).reshape(chunk_rows // _SUBLANE, _SUBLANE, _LANE), axis=0)
        return acc_i, acc_u

    def _reduce_block(masked):
        zero = jnp.zeros((_SUBLANE, _LANE), jnp.float32)
        acc_i, acc_u = lax.fori_loop(
            0, n_chunks, functools.partial(_strip, masked=masked),
            (zero, zero), unroll=True)
        out_ref[0, 0] += acc_i
        out_ref[0, 1] += acc_u

    is_full = block_start + tile_rows <= n_rows

    @pl.when(is_full)
    def _():
        _reduce_block(masked=False)   # fast path: no iota / compare / select

    @pl.when(jnp.logical_not(is_full))
    def _():
        _reduce_block(masked=True)    # final partial / duplicate blocks only


def dice_loss(pred, target, *, smooth=1.0, reduction="mean", eps=1e-7):
    """JAX/Pallas equivalent of DiceLoss.forward.

    pred:   (B, C, H, W) or (B, H, W)
    target: (B, C, H, W) or (B, H, W)
    """
    if target.ndim == 3:
        target = target[:, None]
    if pred.ndim == 3:
        pred = pred[:, None]

    batch = target.shape[0]

    pred_flat = jnp.reshape(pred, (-1,))
    targ_flat = jnp.reshape(target, (-1,))
    n = pred_flat.shape[0]
    assert targ_flat.shape[0] == n, "pred and target must have equal numel"

    sub = max(_packed_sublane(pred.dtype), _packed_sublane(target.dtype))
    rows = n // _LANE
    rows_main = (rows // sub) * sub      # rows streamed through the kernel
    n_main = rows_main * _LANE

    # Ragged tail (< sub*128 + 128 elements): tiny JAX epilogue instead of a
    # full jnp.pad copy of both inputs through HBM.
    inter_tail = jnp.float32(0.0)
    union_tail = jnp.float32(0.0)
    if n_main < n:
        p_tail = pred_flat[n_main:].astype(jnp.float32)
        t_tail = targ_flat[n_main:].astype(jnp.float32)
        inter_tail = jnp.sum(p_tail * t_tail)
        union_tail = jnp.sum(p_tail) + jnp.sum(t_tail)

    if rows_main == 0:
        intersection = inter_tail
        union = union_tail
    else:
        pred2d = jnp.reshape(pred_flat[:n_main], (rows_main, _LANE))
        targ2d = jnp.reshape(targ_flat[:n_main], (rows_main, _LANE))

        kind = _device_kind()
        num_halves = _num_tensorcores(kind)
        bytes_per_row = _LANE * (jnp.dtype(pred2d.dtype).itemsize
                                 + jnp.dtype(targ2d.dtype).itemsize)
        tile_rows = min(_max_tile_rows(kind, bytes_per_row, sub), rows_main)
        chunk_rows = _pick_chunk(tile_rows)

        num_blocks = -(-rows_main // tile_rows)          # ceil div
        blocks_per_half = -(-num_blocks // num_halves)   # ceil div

        def in_index_map(h, b):
            # Clamp so out-of-range blocks re-read the last valid block (the
            # kernel masks them to zero) instead of DMA-ing out of bounds.
            return (jnp.minimum(h * blocks_per_half + b, num_blocks - 1), 0)

        kernel = functools.partial(
            _dice_partial_kernel,
            tile_rows=tile_rows,
            chunk_rows=chunk_rows,
            blocks_per_half=blocks_per_half,
            n_rows=rows_main,
        )

        parts = pl.pallas_call(
            kernel,
            out_shape=jax.ShapeDtypeStruct(
                (num_halves, 2, _SUBLANE, _LANE), jnp.float32),
            grid_spec=pltpu.PrefetchScalarGridSpec(
                num_scalar_prefetch=0,
                grid=(num_halves, blocks_per_half),
                in_specs=[
                    pl.BlockSpec((tile_rows, _LANE), in_index_map),
                    pl.BlockSpec((tile_rows, _LANE), in_index_map),
                ],
                out_specs=pl.BlockSpec(
                    (1, 2, _SUBLANE, _LANE), lambda h, b: (h, 0, 0, 0)),
            ),
            compiler_params=pltpu.CompilerParams(
                dimension_semantics=("parallel", "arbitrary"),
                vmem_limit_bytes=48 * 1024 * 1024,
            ),
        )(pred2d, targ2d)

        # Tiny epilogue: reduce (num_halves, 2, 8, 128) partials to scalars.
        intersection = jnp.sum(parts[:, 0]) + inter_tail
        union = jnp.sum(parts[:, 1]) + union_tail

    dice = (2.0 * intersection + smooth) / (union + smooth + eps)
    loss = 1.0 - dice

    if reduction == "mean":
        return loss
    elif reduction == "sum":
        return loss * jnp.float32(batch)
    else:  # 'none' — module returns the same scalar as 'mean'
        return loss


def _dice_loss_ref(pred, target, *, smooth=1.0, reduction="mean", eps=1e-7):
    """Pure-JAX reference mirroring the PyTorch module."""
    if target.ndim == 3:
        target = target[:, None]
    if pred.ndim == 3:
        pred = pred[:, None]
    pf = jnp.reshape(pred, (-1,)).astype(jnp.float32)
    tf = jnp.reshape(target, (-1,)).astype(jnp.float32)
    inter = jnp.sum(pf * tf)
    union = jnp.sum(pf) + jnp.sum(tf)
    dice = (2.0 * inter + smooth) / (union + smooth + eps)
    loss = 1.0 - dice
    if reduction == "mean":
        return loss
    elif reduction == "sum":
        return loss * target.shape[0]
    else:
        return loss


if __name__ == "__main__":
    key = jax.random.PRNGKey(0)
    kp, kt, kp2, kt2, kp3, kt3 = jax.random.split(key, 6)

    # Test 1: (B, C, H, W) with element count a multiple of 128 (fast path).
    B, C, H, W = 2, 4, 16, 16
    pred = jax.nn.sigmoid(jax.random.normal(kp, (B, C, H, W), dtype=jnp.float32))
    target = (jax.random.uniform(kt, (B, C, H, W)) > 0.5).astype(jnp.float32)
    out = jax.block_until_ready(dice_loss(pred, target, smooth=1.0, reduction="mean"))
    ref = _dice_loss_ref(pred, target, smooth=1.0, reduction="mean")
    assert jnp.allclose(out, ref, atol=1e-5, rtol=1e-5), (out, ref)

    # Test 2: ragged element count (exercises the JAX tail epilogue + 'sum').
    pred2 = jax.nn.sigmoid(jax.random.normal(kp2, (2, 4, 13, 13), dtype=jnp.float32))
    target2 = (jax.random.uniform(kt2, (2, 4, 13, 13)) > 0.5).astype(jnp.float32)
    out2 = jax.block_until_ready(dice_loss(pred2, target2, reduction="sum"))
    ref2 = _dice_loss_ref(pred2, target2, reduction="sum")
    assert jnp.allclose(out2, ref2, atol=1e-5, rtol=1e-5), (out2, ref2)

    # Test 3: 3-D target (unsqueezed inside), pred with C=1.
    pred3 = jax.nn.sigmoid(jax.random.normal(kp3, (2, 1, 32, 32), dtype=jnp.float32))
    target3 = (jax.random.uniform(kt3, (2, 32, 32)) > 0.5).astype(jnp.float32)
    out3 = jax.block_until_ready(dice_loss(pred3, target3))
    ref3 = _dice_loss_ref(pred3, target3)
    assert jnp.allclose(out3, ref3, atol=1e-5, rtol=1e-5), (out3, ref3)

    print("KERNEL_OK")
</pallas_src>

<mosaic_0001>
module attributes {stable_mosaic.version = 11 : i64} {
  func.func @_dice_partial_kernel(%arg0: i32, %arg1: i32, %arg2: memref<16x128xf32, #tpu.memory_space<vmem>>, %arg3: memref<16x128xf32, #tpu.memory_space<vmem>>, %arg4: memref<1x2x8x128xf32, #tpu.memory_space<vmem>>) attributes {dimension_semantics = [#tpu.dimension_semantics<parallel>, #tpu.dimension_semantics<arbitrary>], iteration_bounds = array<i64: 1, 1>, scalar_prefetch = 0 : i64, scratch_operands = 0 : i64, tpu.core_type = #tpu.core_type<tc>, window_params = [{transform_indices = @transform_0, window_bounds = array<i64: 16, 128>}, {transform_indices = @transform_1, window_bounds = array<i64: 16, 128>}, {transform_indices = @transform_2, window_bounds = array<i64: 1, 2, 8, 128>}]} {
    %c0_i32 = arith.constant 0 : i32
    %0 = arith.cmpi eq, %arg1, %c0_i32 : i32
    %1 = arith.extui %0 : i1 to i32
    %c0_i32_0 = arith.constant 0 : i32
    %2 = arith.cmpi ne, %1, %c0_i32_0 : i32
    scf.if %2 {
      %cst = arith.constant 0.000000e+00 : f32
      %13 = vector.broadcast %cst : f32 to vector<1x2x8x128xf32>
      %c0 = arith.constant 0 : index
      %c0_5 = arith.constant 0 : index
      %c0_6 = arith.constant 0 : index
      %c0_7 = arith.constant 0 : index
      %14 = vector.load %arg4[%c0, %c0_5, %c0_6, %c0_7] : memref<1x2x8x128xf32, #tpu.memory_space<vmem>>, vector<1x2x8x128xf32>
      tpu.vector_store %arg4[%c0, %c0_5, %c0_6, %c0_7], %13 {strides = array<i32>} : memref<1x2x8x128xf32, #tpu.memory_space<vmem>>, vector<1x2x8x128xf32>,
    } else {
    }
    %c1_i32 = arith.constant 1 : i32
    %3 = arith.muli %arg0, %c1_i32 : i32
    %4 = arith.addi %3, %arg1 : i32
    %c16_i32 = arith.constant 16 : i32
    %5 = arith.muli %4, %c16_i32 : i32
    %c16_i32_1 = arith.constant 16 : i32
    %6 = arith.addi %5, %c16_i32_1 : i32
    %c16_i32_2 = arith.constant 16 : i32
    %7 = arith.cmpi sle, %6, %c16_i32_2 : i32
    %8 = arith.extui %7 : i1 to i32
    %c0_i32_3 = arith.constant 0 : i32
    %9 = arith.cmpi ne, %8, %c0_i32_3 : i32
    scf.if %9 {
      %cst = arith.constant 0.000000e+00 : f32
      %13 = vector.broadcast %cst : f32 to vector<8x128xf32>
      %c0_i32_5 = arith.constant 0 : i32
      %c16_i32_6 = arith.constant 16 : i32
      %14 = arith.muli %c0_i32_5, %c16_i32_6 : i32
      %15 = tpu.assume_multiple %14, 16 : i32
      %16 = arith.index_cast %15 : i32 to index
      %c0 = arith.constant 0 : index
      %17 = vector.load %arg2[%16, %c0] : memref<16x128xf32, #tpu.memory_space<vmem>>, vector<16x128xf32>
      %18 = arith.index_cast %15 : i32 to index
      %c0_7 = arith.constant 0 : index
      %19 = vector.load %arg3[%18, %c0_7] : memref<16x128xf32, #tpu.memory_space<vmem>>, vector<16x128xf32>
      %20 = arith.mulf %17, %19 : vector<16x128xf32>
      %21 = vector.shape_cast %20 : vector<16x128xf32> to vector<2x8x128xf32>
      %cst_8 = arith.constant dense<0.000000e+00> : vector<8x128xf32>
      %22 = vector.multi_reduction <add>, %21, %cst_8 [0] : vector<2x8x128xf32> to vector<8x128xf32>
      %23 = arith.addf %13, %22 : vector<8x128xf32>
      %24 = arith.addf %17, %19 : vector<16x128xf32>
      %25 = vector.shape_cast %24 : vector<16x128xf32> to vector<2x8x128xf32>
      %cst_9 = arith.constant dense<0.000000e+00> : vector<8x128xf32>
      %26 = vector.multi_reduction <add>, %25, %cst_9 [0] : vector<2x8x128xf32> to vector<8x128xf32>
      %27 = arith.addf %13, %26 : vector<8x128xf32>
      %c1_i32_10 = arith.constant 1 : i32
      %c0_11 = arith.constant 0 : index
      %c0_12 = arith.constant 0 : index
      %c0_13 = arith.constant 0 : index
      %c0_14 = arith.constant 0 : index
      %28 = vector.load %arg4[%c0_11, %c0_12, %c0_13, %c0_14] : memref<1x2x8x128xf32, #tpu.memory_space<vmem>>, vector<1x1x8x128xf32>
      %29 = vector.shape_cast %28 : vector<1x1x8x128xf32> to vector<8x128xf32>
      %30 = arith.addf %29, %23 : vector<8x128xf32>
      %c0_15 = arith.constant 0 : index
      %c0_16 = arith.constant 0 : index
      %c0_17 = arith.constant 0 : index
      %c0_18 = arith.constant 0 : index
      %31 = vector.load %arg4[%c0_15, %c0_16, %c0_17, %c0_18] : memref<1x2x8x128xf32, #tpu.memory_space<vmem>>, vector<1x1x8x128xf32>
      %32 = vector.shape_cast %31 : vector<1x1x8x128xf32> to vector<8x128xf32>
      %33 = vector.shape_cast %30 : vector<8x128xf32> to vector<1x1x8x128xf32>
      tpu.vector_store %arg4[%c0_15, %c0_16, %c0_17, %c0_18], %33 {strides = array<i32>} : memref<1x2x8x128xf32, #tpu.memory_space<vmem>>, vector<1x1x8x128xf32>,
      %c0_19 = arith.constant 0 : index
      %c1 = arith.constant 1 : index
      %c0_20 = arith.constant 0 : index
      %c0_21 = arith.constant 0 : index
      %34 = vector.load %arg4[%c0_19, %c1, %c0_20, %c0_21] : memref<1x2x8x128xf32, #tpu.memory_space<vmem>>, vector<1x1x8x128xf32>
      %35 = vector.shape_cast %34 : vector<1x1x8x128xf32> to vector<8x128xf32>
      %36 = arith.addf %35, %27 : vector<8x128xf32>
      %c0_22 = arith.constant 0 : index
      %c1_23 = arith.constant 1 : index
      %c0_24 = arith.constant 0 : index
      %c0_25 = arith.constant 0 : index
      %37 = vector.load %arg4[%c0_22, %c1_23, %c0_24, %c0_25] : memref<1x2x8x128xf32, #tpu.memory_space<vmem>>, vector<1x1x8x128xf32>
      %38 = vector.shape_cast %37 : vector<1x1x8x128xf32> to vector<8x128xf32>
      %39 = vector.shape_cast %36 : vector<8x128xf32> to vector<1x1x8x128xf32>
      tpu.vector_store %arg4[%c0_22, %c1_23, %c0_24, %c0_25], %39 {strides = array<i32>} : memref<1x2x8x128xf32, #tpu.memory_space<vmem>>, vector<1x1x8x128xf32>,
    } else {
    }
    %true = arith.constant true
    %10 = arith.xori %7, %true : i1
    %11 = arith.extui %10 : i1 to i32
    %c0_i32_4 = arith.constant 0 : i32
    %12 = arith.cmpi ne, %11, %c0_i32_4 : i32
    scf.if %12 {
      %cst = arith.constant 0.000000e+00 : f32
      %13 = vector.broadcast %cst : f32 to vector<8x128xf32>
      %c0_i32_5 = arith.constant 0 : i32
      %c16_i32_6 = arith.constant 16 : i32
      %14 = arith.muli %c0_i32_5, %c16_i32_6 : i32
      %15 = tpu.assume_multiple %14, 16 : i32
      %16 = arith.index_cast %15 : i32 to index
      %c0 = arith.constant 0 : index
      %17 = vector.load %arg2[%16, %c0] : memref<16x128xf32, #tpu.memory_space<vmem>>, vector<16x128xf32>
      %18 = arith.index_cast %15 : i32 to index
      %c0_7 = arith.constant 0 : index
      %19 = vector.load %arg3[%18, %c0_7] : memref<16x128xf32, #tpu.memory_space<vmem>>, vector<16x128xf32>
      %20 = tpu.iota {dimensions = array<i32: 0>} : vector<16x128xi32>
      %21 = arith.addi %5, %15 : i32
      %22 = vector.broadcast %21 : i32 to vector<16x128xi32>
      %23 = arith.addi %22, %20 : vector<16x128xi32>
      %c16_i32_8 = arith.constant 16 : i32
      %24 = vector.broadcast %c16_i32_8 : i32 to vector<16x128xi32>
      %25 = arith.cmpi slt, %23, %24 : vector<16x128xi32>
      %cst_9 = arith.constant 0.000000e+00 : f32
      %26 = vector.broadcast %cst_9 : f32 to vector<16x128xf32>
      %27 = arith.select %25, %17, %26 : vector<16x128xi1>, vector<16x128xf32>
      %cst_10 = arith.constant 0.000000e+00 : f32
      %28 = vector.broadcast %cst_10 : f32 to vector<16x128xf32>
      %29 = arith.select %25, %19, %28 : vector<16x128xi1>, vector<16x128xf32>
      %30 = arith.mulf %27, %29 : vector<16x128xf32>
      %31 = vector.shape_cast %30 : vector<16x128xf32> to vector<2x8x128xf32>
      %cst_11 = arith.constant dense<0.000000e+00> : vector<8x128xf32>
      %32 = vector.multi_reduction <add>, %31, %cst_11 [0] : vector<2x8x128xf32> to vector<8x128xf32>
      %33 = arith.addf %13, %32 : vector<8x128xf32>
      %34 = arith.addf %27, %29 : vector<16x128xf32>
      %35 = vector.shape_cast %34 : vector<16x128xf32> to vector<2x8x128xf32>
      %cst_12 = arith.constant dense<0.000000e+00> : vector<8x128xf32>
      %36 = vector.multi_reduction <add>, %35, %cst_12 [0] : vector<2x8x128xf32> to vector<8x128xf32>
      %37 = arith.addf %13, %36 : vector<8x128xf32>
      %c1_i32_13 = arith.constant 1 : i32
      %c0_14 = arith.constant 0 : index
      %c0_15 = arith.constant 0 : index
      %c0_16 = arith.constant 0 : index
      %c0_17 = arith.constant 0 : index
      %38 = vector.load %arg4[%c0_14, %c0_15, %c0_16, %c0_17] : memref<1x2x8x128xf32, #tpu.memory_space<vmem>>, vector<1x1x8x128xf32>
      %39 = vector.shape_cast %38 : vector<1x1x8x128xf32> to vector<8x128xf32>
      %40 = arith.addf %39, %33 : vector<8x128xf32>
      %c0_18 = arith.constant 0 : index
      %c0_19 = arith.constant 0 : index
      %c0_20 = arith.constant 0 : index
      %c0_21 = arith.constant 0 : index
      %41 = vector.load %arg4[%c0_18, %c0_19, %c0_20, %c0_21] : memref<1x2x8x128xf32, #tpu.memory_space<vmem>>, vector<1x1x8x128xf32>
      %42 = vector.shape_cast %41 : vector<1x1x8x128xf32> to vector<8x128xf32>
      %43 = vector.shape_cast %40 : vector<8x128xf32> to vector<1x1x8x128xf32>
      tpu.vector_store %arg4[%c0_18, %c0_19, %c0_20, %c0_21], %43 {strides = array<i32>} : memref<1x2x8x128xf32, #tpu.memory_space<vmem>>, vector<1x1x8x128xf32>,
      %c0_22 = arith.constant 0 : index
      %c1 = arith.constant 1 : index
      %c0_23 = arith.constant 0 : index
      %c0_24 = arith.constant 0 : index
      %44 = vector.load %arg4[%c0_22, %c1, %c0_23, %c0_24] : memref<1x2x8x128xf32, #tpu.memory_space<vmem>>, vector<1x1x8x128xf32>
      %45 = vector.shape_cast %44 : vector<1x1x8x128xf32> to vector<8x128xf32>
      %46 = arith.addf %45, %37 : vector<8x128xf32>
      %c0_25 = arith.constant 0 : index
      %c1_26 = arith.constant 1 : index
      %c0_27 = arith.constant 0 : index
      %c0_28 = arith.constant 0 : index
      %47 = vector.load %arg4[%c0_25, %c1_26, %c0_27, %c0_28] : memref<1x2x8x128xf32, #tpu.memory_space<vmem>>, vector<1x1x8x128xf32>
      %48 = vector.shape_cast %47 : vector<1x1x8x128xf32> to vector<8x128xf32>
      %49 = vector.shape_cast %46 : vector<8x128xf32> to vector<1x1x8x128xf32>
      tpu.vector_store %arg4[%c0_25, %c1_26, %c0_27, %c0_28], %49 {strides = array<i32>} : memref<1x2x8x128xf32, #tpu.memory_space<vmem>>, vector<1x1x8x128xf32>,
    } else {
    }
    return
  }
  func.func @transform_0(%arg0: i32, %arg1: i32) -> (i32, i32) {
    %c1_i32 = arith.constant 1 : i32
    %0 = arith.muli %arg0, %c1_i32 : i32
    %1 = arith.addi %0, %arg1 : i32
    %c0_i32 = arith.constant 0 : i32
    %2 = arith.minsi %1, %c0_i32 : i32
    %c0_i32_0 = arith.constant 0 : i32
    %c0_i32_1 = arith.constant 0 : i32
    return %2, %c0_i32_0 : i32, i32
  }
  func.func @transform_1(%arg0: i32, %arg1: i32) -> (i32, i32) {
    %c1_i32 = arith.constant 1 : i32
    %0 = arith.muli %arg0, %c1_i32 : i32
    %1 = arith.addi %0, %arg1 : i32
    %c0_i32 = arith.constant 0 : i32
    %2 = arith.minsi %1, %c0_i32 : i32
    %c0_i32_0 = arith.constant 0 : i32
    %c0_i32_1 = arith.constant 0 : i32
    return %2, %c0_i32_0 : i32, i32
  }
  func.func @transform_2(%arg0: i32, %arg1: i32) -> (i32, i32, i32, i32) {
    %c0_i32 = arith.constant 0 : i32
    %c0_i32_0 = arith.constant 0 : i32
    %c0_i32_1 = arith.constant 0 : i32
    %c0_i32_2 = arith.constant 0 : i32
    return %arg0, %c0_i32, %c0_i32_0, %c0_i32_1 : i32, i32, i32, i32
  }
}

</mosaic_0001>

<bundles_post_ra>
// kernel: tpu_custom_call.1
= control target key start
LH: loop header
LB: loop body
LE: loop exit
PB: predicated region body
PF: predicated region fallthrough
CT: control target
= control target key end

     0   :  { %7 = vsyncpa [#allocation3], 0  ;;  %s293_s0 = inlined_call_operand.hbm [shape: f32[16,128], index: 0, kind: input, shape index: {}]   ;;  %s294_s1 = inlined_call_operand.hbm [shape: f32[16,128], index: 1, kind: input, shape index: {}]   ;;  %s295_s2 = inlined_call_operand.hbm [shape: f32[1,2,8,128], index: 2, kind: output, shape index: {}]  }
   0x1   :  { %8 = vsyncpa [#allocation6], 0 }
   0x2   :  { %9 = vsyncpa [#allocation4], 0  ;;  %s228_s9 = smov [#allocation2]   ;;  %s156_s13 = scalar_lea.hbm %s293_s0, 256 }
   0x3   :  { %s21_s10 = sshll.u32 %s228_s9, 4  ;;  %p157_p0 = scmp.ne.s32.totalorder %s293_s0, %s156_s13  ;;  %s22_s10 = int_to_ptr.vmem [resolvable:$true] %s21_s10 }
   0x4   :  { %p160_p1 = scmp.lt.u32.totalorder %s156_s13, %s293_s0 }
   0x6   :  { %p162_p2 = pnand %p160_p1, %p157_p0 }
   0x8   :  { %165 = shalt.err (!%p162_p2)
}
   0x9   :  { %s166_s18 = scalar_lea.vmem %s22_s10, 256  ;;  %p171_p4 = scmp.lt.s32.totalorder %s22_s10, %s22_s10 }
   0xa   :  { %p167_p3 = scmp.ne.s32.totalorder %s22_s10, %s166_s18  ;;  %p172_p5 = scmp.lt.s32.totalorder %s166_s18, %s166_s18 }
   0xc   :  { %p173_p6 = por %p172_p5, %p171_p4 }
   0xe   :  { %p174_p7 = pnand %p173_p6, %p167_p3 }
  0x10   :  { %177 = shalt.err (!%p174_p7)
}
  0x11   :  { %s229_s19 = smov 128   ;;  %s230_s20 = smov 8  }
  0x12   :  { %27 = dma.hbm_to_vmem [thread:$0]  %s293_s0, 256, %s22_s10, [#allocation3], %s229_s19, %s229_s19, %s230_s20  }
  0x13   :  { %s231_s23 = smov [#allocation5]   ;;  %s178_s27 = scalar_lea.hbm %s294_s1, 256 }
  0x14   :  { %s39_s24 = sshll.u32 %s231_s23, 4  ;;  %p179_p8 = scmp.ne.s32.totalorder %s294_s1, %s178_s27  ;;  %s40_s24 = int_to_ptr.vmem [resolvable:$true] %s39_s24 }
  0x15   :  { %p182_p9 = scmp.lt.u32.totalorder %s178_s27, %s294_s1 }
  0x17   :  { %p184_p10 = pnand %p182_p9, %p179_p8 }
  0x19   :  { %187 = shalt.err (!%p184_p10)
}
  0x1a   :  { %s188_s4 = scalar_lea.vmem %s40_s24, 256  ;;  %p193_p12 = scmp.lt.s32.totalorder %s40_s24, %s40_s24 }
  0x1b   :  { %p189_p11 = scmp.ne.s32.totalorder %s40_s24, %s188_s4  ;;  %p194_p13 = scmp.lt.s32.totalorder %s188_s4, %s188_s4 }
  0x1d   :  { %p195_p0 = por %p194_p13, %p193_p12 }
  0x1f   :  { %p196_p1 = pnand %p195_p0, %p189_p11 }
  0x21   :  { %199 = shalt.err (!%p196_p1)
}
  0x22   :  { %45 = dma.hbm_to_vmem [thread:$0]  %s294_s1, 256, %s40_s24, [#allocation6], %s229_s19, %s229_s19, %s230_s20  }
  0x23   :  { %222 = dma.done.wait [#allocation3], 256  }
  0x24   :  { %223 = vsyncadd [#allocation3], 4294967040 }
  0x25   :  { %224 = dma.done.wait [#allocation6], 256  }
  0x26   :  { %225 = vsyncadd [#allocation6], 4294967040  ;;  %v73_v0 = vld [vmem:[#allocation2] sm:$0xff]  ;;  %v74_v1 = vld [vmem:[#allocation2 + $0x8] sm:$0xff]  ;;  %s232_s6 = smov [#allocation7]  }
  0x27   :  { %v75_v2 = vld [vmem:[#allocation5] sm:$0xff]  ;;  %v76_v3 = vld [vmem:[#allocation5 + $0x8] sm:$0xff]  ;;  %s133_s7 = sshll.u32 %s232_s6, 4  ;;  %s134_s7 = int_to_ptr.vmem [resolvable:$true] %s133_s7 }
  0x28   :  { %v77_v4 = vmul.f32 %v75_v2, %v73_v0  ;;  %v81_v5 = vadd.f32 %v75_v2, %v73_v0  ;;  %v78_v6 = vmul.f32 %v76_v3, %v74_v1  ;;  %v82_v7 = vadd.f32 %v76_v3, %v74_v1  ;;  %s200_s1 = scalar_lea.vmem %s134_s7, 256  ;;  %p205_p3 = scmp.lt.s32.totalorder %s134_s7, %s134_s7 }
  0x29   :  { %p201_p2 = scmp.ne.s32.totalorder %s134_s7, %s200_s1  ;;  %p206_p4 = scmp.lt.s32.totalorder %s200_s1, %s200_s1 }
  0x2a   :  { %v79_v8 = vadd.f32 %v78_v6, %v77_v4  ;;  %v83_v9 = vadd.f32 %v82_v7, %v81_v5 }
  0x2b   :  { %p207_p5 = por %p206_p4, %p205_p3 }
  0x2c   :  { %87 = vst [vmem:[#allocation7] sm:$0xff] %v79_v8  ;;  %91 = vst [vmem:[#allocation7 + $0x8] sm:$0xff] %v83_v9 }
  0x2d   :  { %p208_p6 = pnand %p207_p5, %p201_p2 }
  0x2f   :  { %211 = shalt.err (!%p208_p6)
}
  0x30   :  { %s212_s10 = scalar_lea.hbm %s295_s2, 256 }
  0x31   :  { %p213_p7 = scmp.ne.s32.totalorder %s295_s2, %s212_s10  ;;  %p216_p8 = scmp.lt.u32.totalorder %s212_s10, %s295_s2 }
  0x33   :  { %p218_p9 = pnand %p216_p8, %p213_p7 }
  0x35   :  { %221 = shalt.err (!%p218_p9)
}
  0x36   :  { %139 = dma.vmem_to_hbm [thread:$0]  %s134_s7, 256, %s295_s2, [#allocation4], %s229_s19, %s229_s19, %s230_s20  }
  0x37   :  { %226 = dma.done.wait [#allocation4], 256  }
  0x38   :  { %227 = vsyncadd [#allocation4], 4294967040 }
  0x39   :  { %143 = vsyncpa [#allocation3], 1 }
  0x3a   :  { %144 = vsyncpa [#allocation6], 1 }
  0x3b   :  { %145 = vsyncpa [#allocation4], 1 }

</bundles_post_ra>
